<compile_context>
chip_gen: v7x
topology: tpu7x:2x2x1
jax: 0.10.0
libtpu: 0.0.40
codegen_flags: <defaults>
</compile_context>

<pallas_src>
import functools

import jax
import jax.numpy as jnp
from jax.experimental import pallas as pl
from jax.experimental.pallas import tpu as pltpu


def _logistic_kernel(x_ref, wt_ref, b_ref, out_ref):
    # x_ref:  (TB, D)      matmul dtype (bf16)
    # wt_ref: (D, C_pad)   matmul dtype (bf16), cols >= C-1 are zero
    # b_ref:  (1, C_pad)   f32, entries >= C are -1e30 (mask fake classes)
    # out_ref:(TB, C_pad)  f32
    logits = jnp.dot(x_ref[...], wt_ref[...], preferred_element_type=jnp.float32)
    logits = logits + b_ref[...]                      # broadcast bias over batch
    m = jnp.max(logits, axis=-1, keepdims=True)       # finite (real classes)
    e = jnp.exp(logits - m)                           # fake classes -> exp(-1e30)=0
    s = jnp.sum(e, axis=-1, keepdims=True)
    out_ref[...] = e * pl.reciprocal(s, approx=True)  # EUP, off the VALU path


def _round_up(x, m):
    return ((x + m - 1) // m) * m


def _choose_batch_tile(B, D, C_pad, x_itemsize, w_itemsize,
                       budget_bytes=12 * 1024 * 1024, cap=512):
    """Largest batch tile (multiple of 16) fitting a conservative VMEM budget.

    budget >= 2*TB*D*x_bytes (double-buffered x) + 2*TB*C_pad*4 (out)
              + D*C_pad*w_bytes + C_pad*4 (resident weights / bias)
    """
    resident = D * C_pad * w_itemsize + C_pad * 4
    per_row = 2 * D * x_itemsize + 2 * C_pad * 4
    tb = max(16, (budget_bytes - resident) // per_row)
    tb = int(min(tb, cap))
    tb = max(16, (tb // 16) * 16)
    # never tile past the (16-padded) batch itself
    tb = min(tb, _round_up(B, 16))
    return tb


def prepare_params(W, bias, *, matmul_dtype=jnp.bfloat16):
    """One-time (per model) weight prep; hoisted out of the per-call path.

    Returns:
      wt_pad: (D, C_pad)  transposed W with a zero column for the implicit
              zero-logit class and zero columns for lane padding.
      b_pad:  (1, C_pad)  f32 bias, -1e30 on the padded fake classes.
      C:      true number of classes.
    """
    C = bias.shape[0]
    D = W.shape[1]
    C_pad = _round_up(max(C, 1), 128)
    wt_pad = jnp.zeros((D, C_pad), matmul_dtype)
    wt_pad = wt_pad.at[:, : C - 1].set(W.T.astype(matmul_dtype))
    b_pad = jnp.full((1, C_pad), -1e30, jnp.float32)
    b_pad = b_pad.at[0, :C].set(bias.astype(jnp.float32))
    return wt_pad, b_pad, C


def logistic_forward_prepared(x, wt_pad, b_pad, n_classes,
                              *, matmul_dtype=jnp.bfloat16):
    """Forward pass using pre-prepared (padded/transposed) parameters."""
    x = jnp.atleast_2d(x)
    B, D = x.shape
    C = n_classes
    C_pad = wt_pad.shape[1]

    x_m = x.astype(matmul_dtype)
    x_bytes = jnp.dtype(matmul_dtype).itemsize
    TB = _choose_batch_tile(B, D, C_pad, x_bytes, x_bytes)
    B_pad = _round_up(B, TB)
    if B_pad != B:
        x_m = jnp.pad(x_m, ((0, B_pad - B), (0, 0)))

    grid = (B_pad // TB,)
    out = pl.pallas_call(
        _logistic_kernel,
        out_shape=jax.ShapeDtypeStruct((B_pad, C_pad), jnp.float32),
        grid=grid,
        in_specs=[
            pl.BlockSpec((TB, D), lambda i: (i, 0)),       # streamed per tile
            pl.BlockSpec((D, C_pad), lambda i: (0, 0)),    # VMEM-resident
            pl.BlockSpec((1, C_pad), lambda i: (0, 0)),    # VMEM-resident
        ],
        out_specs=pl.BlockSpec((TB, C_pad), lambda i: (i, 0)),
        compiler_params=pltpu.CompilerParams(
            dimension_semantics=("parallel",),
        ),
    )(x_m, wt_pad, b_pad)

    out = out[:B, :C]
    # torch .squeeze(dim=0): drops leading dim only when B == 1
    if B == 1:
        out = out.reshape(C)
    return out


def logistic_regression_forward(x, W, bias, *, matmul_dtype=jnp.bfloat16):
    """Convenience wrapper matching LogisticRegression.forward(x).

    x: (B, D) or (D,); W: (C-1, D); bias: (C,).
    """
    wt_pad, b_pad, C = prepare_params(W, bias, matmul_dtype=matmul_dtype)
    return logistic_forward_prepared(x, wt_pad, b_pad, C,
                                     matmul_dtype=matmul_dtype)


if __name__ == "__main__":
    key = jax.random.PRNGKey(0)
    k_x, k_w, k_b = jax.random.split(key, 3)

    batch = 4
    input_dim = 32
    n_classes = 8

    x = jax.random.normal(k_x, (batch, input_dim), dtype=jnp.float32)
    # Module inits W/bias to zeros; use scaled normals for a non-trivial test.
    W = 0.1 * jax.random.normal(k_w, (n_classes - 1, input_dim), dtype=jnp.float32)
    bias = 0.05 * jax.random.normal(k_b, (n_classes,), dtype=jnp.float32)

    fwd = jax.jit(functools.partial(logistic_regression_forward))
    out = fwd(x, W, bias)
    out = jax.block_until_ready(out)
    assert out.shape == (batch, n_classes)

    # Reference matched to the kernel's MXU numerics (bf16 inputs, f32 accum).
    x_b = x.astype(jnp.bfloat16).astype(jnp.float32)
    W_b = W.astype(jnp.bfloat16).astype(jnp.float32)
    preds_b = x_b @ W_b.T
    exp_b = jnp.concatenate([preds_b, jnp.zeros((batch, 1), jnp.float32)], axis=1)
    ref_b = jax.nn.softmax(exp_b + bias[None, :], axis=-1)
    assert jnp.allclose(out, ref_b, atol=2e-3, rtol=2e-3)

    # Coarser sanity check against the exact f32 PyTorch-semantics reference.
    preds = x @ W.T
    expanded = jnp.concatenate([preds, jnp.zeros((batch, 1), jnp.float32)], axis=1)
    ref = jax.nn.softmax(expanded + bias[None, :], axis=-1)
    assert jnp.allclose(out, ref, atol=2e-2, rtol=2e-2)

    # 1-D input path: atleast_2d + squeeze(dim=0) semantics -> shape (C,)
    out1 = jax.block_until_ready(logistic_regression_forward(x[0], W, bias))
    assert out1.shape == (n_classes,)
    assert jnp.allclose(out1, ref_b[0], atol=2e-3, rtol=2e-3)

    print("KERNEL_OK")
</pallas_src>

<mosaic_0001>
module attributes {stable_mosaic.version = 11 : i64} {
  func.func @_logistic_kernel(%arg0: i32, %arg1: memref<16x32xbf16, #tpu.memory_space<vmem>>, %arg2: memref<32x128xbf16, #tpu.memory_space<vmem>>, %arg3: memref<1x128xf32, #tpu.memory_space<vmem>>, %arg4: memref<16x128xf32, #tpu.memory_space<vmem>>) attributes {dimension_semantics = [#tpu.dimension_semantics<parallel>], iteration_bounds = array<i64: 1>, scalar_prefetch = 0 : i64, scratch_operands = 0 : i64, tpu.core_type = #tpu.core_type<tc>, window_params = [{transform_indices = @transform_0, window_bounds = array<i64: 16, 32>}, {pipeline_mode = #tpu.pipeline_mode<synchronous>, transform_indices = @transform_1, window_bounds = array<i64: 32, 128>}, {pipeline_mode = #tpu.pipeline_mode<synchronous>, transform_indices = @transform_2, window_bounds = array<i64: 1, 128>}, {transform_indices = @transform_3, window_bounds = array<i64: 16, 128>}]} {
    %c0 = arith.constant 0 : index
    %c0_0 = arith.constant 0 : index
    %0 = vector.load %arg1[%c0, %c0_0] : memref<16x32xbf16, #tpu.memory_space<vmem>>, vector<16x32xbf16>
    %c0_1 = arith.constant 0 : index
    %c0_2 = arith.constant 0 : index
    %1 = vector.load %arg2[%c0_1, %c0_2] : memref<32x128xbf16, #tpu.memory_space<vmem>>, vector<32x128xbf16>
    %cst = arith.constant dense<0.000000e+00> : vector<16x128xf32>
    %2 = tpu.matmul %0, %1, %cst {dimension_numbers = #tpu.dot_dimension_numbers<[1], [0], [0], [1], [0, 0, 1, 1], [], []>} : vector<16x32xbf16>, vector<32x128xbf16>, vector<16x128xf32> -> vector<16x128xf32>
    %c0_3 = arith.constant 0 : index
    %c0_4 = arith.constant 0 : index
    %3 = vector.load %arg3[%c0_3, %c0_4] : memref<1x128xf32, #tpu.memory_space<vmem>>, vector<1x128xf32>
    %4 = vector.broadcast %3 : vector<1x128xf32> to vector<16x128xf32>
    %5 = arith.addf %2, %4 : vector<16x128xf32>
    %cst_5 = arith.constant dense<0xFF800000> : vector<16xf32>
    %6 = vector.multi_reduction <maximumf>, %5, %cst_5 [1] : vector<16x128xf32> to vector<16xf32>
    %7 = vector.shape_cast %6 : vector<16xf32> to vector<16x1xf32>
    %8 = vector.broadcast %7 : vector<16x1xf32> to vector<16x128xf32>
    %9 = arith.subf %5, %8 : vector<16x128xf32>
    %10 = math.exp %9 : vector<16x128xf32>
    %cst_6 = arith.constant dense<0.000000e+00> : vector<16xf32>
    %11 = vector.multi_reduction <add>, %10, %cst_6 [1] : vector<16x128xf32> to vector<16xf32>
    %12 = vector.shape_cast %11 : vector<16xf32> to vector<16x1xf32>
    %13 = tpu.reciprocal %12 {approx = true} : vector<16x1xf32> -> vector<16x1xf32>
    %14 = vector.broadcast %13 : vector<16x1xf32> to vector<16x128xf32>
    %15 = arith.mulf %10, %14 : vector<16x128xf32>
    %c0_7 = arith.constant 0 : index
    %c0_8 = arith.constant 0 : index
    %16 = vector.load %arg4[%c0_7, %c0_8] : memref<16x128xf32, #tpu.memory_space<vmem>>, vector<16x128xf32>
    tpu.vector_store %arg4[%c0_7, %c0_8], %15 {strides = array<i32>} : memref<16x128xf32, #tpu.memory_space<vmem>>, vector<16x128xf32>,
    return
  }
  func.func @transform_0(%arg0: i32) -> (i32, i32) {
    %c0_i32 = arith.constant 0 : i32
    %c0_i32_0 = arith.constant 0 : i32
    return %arg0, %c0_i32 : i32, i32
  }
  func.func @transform_1(%arg0: i32) -> (i32, i32) {
    %c0_i32 = arith.constant 0 : i32
    %c0_i32_0 = arith.constant 0 : i32
    %c0_i32_1 = arith.constant 0 : i32
    return %c0_i32, %c0_i32_0 : i32, i32
  }
  func.func @transform_2(%arg0: i32) -> (i32, i32) {
    %c0_i32 = arith.constant 0 : i32
    %c0_i32_0 = arith.constant 0 : i32
    %c0_i32_1 = arith.constant 0 : i32
    return %c0_i32, %c0_i32_0 : i32, i32
  }
  func.func @transform_3(%arg0: i32) -> (i32, i32) {
    %c0_i32 = arith.constant 0 : i32
    %c0_i32_0 = arith.constant 0 : i32
    return %arg0, %c0_i32 : i32, i32
  }
}

</mosaic_0001>

<bundles_post_ra>
// kernel: logistic_regression_forward.1
= control target key start
LH: loop header
LB: loop body
LE: loop exit
PB: predicated region body
PF: predicated region fallthrough
CT: control target
= control target key end

     0   :  { %v143_v0 = vmov 0.0   ;;  %vm144_vm0 = vmmov 0   ;;  %vm45_vm1 = vcmask 261120   ;;  %s183_s1 = inlined_call_operand.vmem [shape: bf16[32,128], index: 1, kind: input, shape index: {}]   ;;  %s184_s0 = inlined_call_operand.vmem [shape: bf16[16,32], index: 0, kind: input, shape index: {}]   ;;  %s185_s2 = inlined_call_operand.vmem [shape: f32[1,128], index: 2, kind: input, shape index: {}]   ;;  %s186_s3 = inlined_call_operand.vmem [shape: f32[16,128], index: 3, kind: output, shape index: {}]  }
   0x1   :  { %122 = vmatprep.subr.bf16.mxu0 %v143_v0  ;;  %v132_v1 = vld [vmem:[%s183_s1] sm:$0xff]   ;;  %126 = vmatprep.mubr.msk.bf16.mxu0 %vm144_vm0, %v143_v0  ;;  %v133_v2 = vld [vmem:[%s183_s1 + $0x8] sm:$0xff]  }
   0x2   :  { %123 = vmatpush3.bf16.msra.mxu0 %v132_v1  ;;  %v134_v3 = vld [vmem:[%s184_s0] sm:$0xff]  }
   0x3   :  { %124 = vmatprep.subr.bf16.mxu0 %v143_v0  ;;  %v114_v4 = vld [vmem:[%s185_s2] ss:$0 sm:$0xff] }
   0x6   :  { %125 = vmatpush3.bf16.msra.mxu0 %v133_v2 }
   0x9   :  { %127 = vmatmul.mubr.msk.bf16.vlgmr.msra.gmra.mrb[0].mxu0 %vm45_vm1, %v134_v3 }
  0xdc   :  { %v83_v5 = vpop.f32.mrb[0].mxu0 }
  0xdd   :  { %v84_v6 = vadd.f32 %v114_v4, %v83_v5  ;;  %v128_v7 = vpop.f32.mrb[1].mxu0 }
  0xde   :  { %v86_v8 = vpop.f32.mrb[2].mxu0 }
  0xdf   :  { %90 = vmax.xlane.f32.xlu0 %v84_v6  ;;  %v129_v9 = vpop.f32.mrb[3].mxu0  ;;  %v87_v10 = vadd.f32 %v114_v4, %v86_v8 }
  0xe3   :  { %92 = vmax.xlane.f32.xlu0 %v87_v10 }
 0x16c   :  { %v91_v11 = vpop.xlane.xlu0 %90 }
 0x16d   :  { %v94_v12 = vsub.f32 %v84_v6, %v91_v11 }
 0x16f   :  { %v96_v13 = vmul.f32 1.442695, %v94_v12 }
 0x170   :  { %v93_v14 = vpop.xlane.xlu0 %92 }
 0x171   :  { %135 = vpow2.f32 %v96_v13  ;;  %v95_v15 = vsub.f32 %v87_v10, %v93_v14 }
 0x173   :  { %v98_v16 = vmul.f32 1.442695, %v95_v15 }
 0x175   :  { %137 = vpow2.f32 %v98_v16 }
 0x17b   :  { %v136_v17 = vpop.eup %135 }
 0x17c   :  { %100 = vadd.xlane.f32.xlu1 %v136_v17 }
 0x17f   :  { %v138_v18 = vpop.eup %137 }
 0x180   :  { %102 = vadd.xlane.f32.xlu1 %v138_v18 }
 0x209   :  { %v101_v19 = vpop.xlane.xlu1 %100 }
 0x20a   :  { %139 = vrcp.f32 %v101_v19 }
 0x20d   :  { %v103_v20 = vpop.xlane.xlu1 %102 }
 0x20e   :  { %141 = vrcp.f32 %v103_v20 }
 0x214   :  { %v140_v21 = vpop.eup %139 }
 0x215   :  { %v106_v22 = vmul.f32 %v140_v21, %v136_v17 }
 0x217   :  { %108 = vst [vmem:[%s186_s3] sm:$0xff] %v106_v22 }
 0x218   :  { %v142_v23 = vpop.eup %141 }
 0x219   :  { %v107_v24 = vmul.f32 %v142_v23, %v138_v18 }
 0x21b   :  { %109 = vst [vmem:[%s186_s3 + $0x8] sm:$0xff] %v107_v24 }

</bundles_post_ra>
